<compile_context>
chip_gen: v5e
topology: v5e:2x2
jax: 0.10.0
libtpu: 0.0.40
codegen_flags: <defaults>
</compile_context>

<pallas_src>
import functools

import jax
import jax.numpy as jnp
from jax import lax
from jax.experimental import pallas as pl
from jax.experimental.pallas import tpu as pltpu
import numpy as np


def _patch_embed_norm_kernel(x_ref, gamma_ref, beta_ref, o_ref, *, eps):
    # x_ref:              (1, C, TN)  input tile: C on sublanes, N on lanes
    # gamma_ref/beta_ref: (C, 1)      fp32 per-channel LayerNorm params
    # o_ref:              (1, TN, C)  output tile: C on lanes
    x = x_ref[0].astype(jnp.float32)                          # (C, TN)
    inv_c = jnp.float32(1.0 / x.shape[0])

    # Stats over the channel (sublane) axis: VALU adds, XLU stays free.
    mean = jnp.sum(x, axis=0, keepdims=True) * inv_c          # (1, TN)
    d = x - mean                                              # (C, TN)
    var = jnp.sum(d * d, axis=0, keepdims=True) * inv_c       # (1, TN) two-pass
    inv = lax.rsqrt(var + eps)                                # (1, TN)  EUP slot

    # Broadcast-apply directly; no (TN, C)/(C, TN)-sized scale temp.
    y = d * inv * gamma_ref[...] + beta_ref[...]              # (C, TN)

    # Single fused transpose of the finished tile for the lane-dense store.
    o_ref[0] = jnp.transpose(y, (1, 0)).astype(o_ref.dtype)


def _choose_block_n(n, c, itemsize):
    """Largest N-tile (multiple of 128, preferably dividing N) fitting VMEM."""
    # Per N-row: double-buffered input row + double-buffered output row
    # (C * itemsize each) + ~4 live fp32 working tiles (x, d, y, y^T).
    per_row = 2 * c * itemsize + 2 * c * itemsize + 4 * c * 4
    budget = 14 * 1024 * 1024   # conservative vs the 32 MiB scoped limit (v7x-safe)
    tn = min(int(budget // per_row), 2048)   # 1k-2k rows ~ HBM roofline already
    tn = max((tn // 128) * 128, 128)
    if n <= tn:
        return n
    # Prefer a tile that divides N: no padded tail block (wasted DMA/compute,
    # stats on uninitialized rows — harmless but pointless).
    for cand in range(tn, 127, -128):
        if n % cand == 0:
            return cand
    return tn


def patch_embed_forward(x, gamma=None, beta=None, *, eps=1e-5, block_n=None):
    """PatchEmbed.forward.

    Args:
      x: (B, C, H, W) input (C == embed_dim; the module has no projection).
      gamma, beta: optional LayerNorm(embed_dim) params of shape (C,).
        If both are None, no norm is applied (norm_layer=None case).
      eps: LayerNorm epsilon.
      block_n: optional override for the N tile size (multiple of 128).

    Returns:
      (B, H*W, C)
    """
    B, C, H, W = x.shape
    N = H * W
    x_cn = x.reshape(B, C, N)   # free, contiguous reshape (no HBM pass)

    if gamma is None and beta is None:
        # norm_layer=None: pure layout transform, nothing to compute.
        return jnp.transpose(x_cn, (0, 2, 1))

    if gamma is None:
        gamma = jnp.ones((C,), dtype=jnp.float32)
    if beta is None:
        beta = jnp.zeros((C,), dtype=jnp.float32)
    # (C, 1) sublane vectors so they broadcast across lanes in the (C, TN) layout.
    gamma_c1 = gamma.astype(jnp.float32).reshape(C, 1)
    beta_c1 = beta.astype(jnp.float32).reshape(C, 1)

    tn = block_n if block_n is not None else _choose_block_n(N, C, x.dtype.itemsize)
    # N-tile axis outermost: megacore (v7x) shards it even for B == 1.
    grid = (pl.cdiv(N, tn), B)

    kernel = functools.partial(_patch_embed_norm_kernel, eps=eps)
    # NOTE: for forced tiny tiles (TN ~ 128) DMA latency is exposed (~0.35 us
    # per grid step); pipeline_mode=pl.Buffered(3) on the input spec would hide
    # it, but realistic N keeps TN >= 1024 so we keep default double-buffering.
    out = pl.pallas_call(
        kernel,
        out_shape=jax.ShapeDtypeStruct((B, N, C), x.dtype),
        grid_spec=pltpu.PrefetchScalarGridSpec(
            num_scalar_prefetch=0,
            grid=grid,
            in_specs=[
                pl.BlockSpec((1, C, tn), lambda n, b: (b, 0, n)),
                pl.BlockSpec((C, 1), lambda n, b: (0, 0)),
                pl.BlockSpec((C, 1), lambda n, b: (0, 0)),
            ],
            out_specs=pl.BlockSpec((1, tn, C), lambda n, b: (b, n, 0)),
        ),
        compiler_params=pltpu.CompilerParams(
            dimension_semantics=("parallel", "parallel"),
            vmem_limit_bytes=32 * 1024 * 1024,
        ),
    )(x_cn, gamma_c1, beta_c1)
    return out


def _reference(x, gamma, beta, eps=1e-5):
    B, C, H, W = x.shape
    x_bnc = jnp.transpose(x.reshape(B, C, H * W), (0, 2, 1)).astype(jnp.float32)
    mean = jnp.mean(x_bnc, axis=-1, keepdims=True)
    var = jnp.mean((x_bnc - mean) ** 2, axis=-1, keepdims=True)
    y = (x_bnc - mean) / jnp.sqrt(var + eps)
    return y * gamma.astype(jnp.float32) + beta.astype(jnp.float32)


if __name__ == "__main__":
    # Small TPU-friendly config: embed_dim = 128 (lane-dense channels), 16x16 spatial.
    B, C, H, W = 2, 128, 16, 16
    key = jax.random.PRNGKey(0)
    kx, kg, kb = jax.random.split(key, 3)
    x = jax.random.normal(kx, (B, C, H, W), dtype=jnp.float32)
    gamma = 1.0 + 0.1 * jax.random.normal(kg, (C,), dtype=jnp.float32)
    beta = 0.1 * jax.random.normal(kb, (C,), dtype=jnp.float32)

    ref = _reference(x, gamma, beta)

    # Default tile choice (TN == N = 256 here; grid = (1, B)).
    out = jax.block_until_ready(patch_embed_forward(x, gamma, beta))
    assert out.shape == (B, H * W, C), out.shape
    np.testing.assert_allclose(np.asarray(out), np.asarray(ref), rtol=1e-5, atol=1e-5)

    # Forced multi-tile N path (grid = (2, B)) to exercise tiling / index maps.
    out_tiled = jax.block_until_ready(
        patch_embed_forward(x, gamma, beta, block_n=128))
    np.testing.assert_allclose(np.asarray(out_tiled), np.asarray(ref),
                               rtol=1e-5, atol=1e-5)

    # norm_layer=None path (pure layout transform, no kernel needed).
    out_nonorm = jax.block_until_ready(patch_embed_forward(x))
    ref_nonorm = jnp.transpose(x.reshape(B, C, H * W), (0, 2, 1))
    np.testing.assert_allclose(np.asarray(out_nonorm), np.asarray(ref_nonorm))

    print("KERNEL_OK")
</pallas_src>

<mosaic_0001>
module attributes {stable_mosaic.version = 11 : i64} {
  func.func @_patch_embed_norm_kernel(%arg0: i32, %arg1: i32, %arg2: memref<1x128x256xf32, #tpu.memory_space<vmem>>, %arg3: memref<128x1xf32, #tpu.memory_space<vmem>>, %arg4: memref<128x1xf32, #tpu.memory_space<vmem>>, %arg5: memref<1x256x128xf32, #tpu.memory_space<vmem>>) attributes {dimension_semantics = [#tpu.dimension_semantics<parallel>, #tpu.dimension_semantics<parallel>], iteration_bounds = array<i64: 1, 2>, scalar_prefetch = 0 : i64, scratch_operands = 0 : i64, tpu.core_type = #tpu.core_type<tc>, window_params = [{transform_indices = @transform_0, window_bounds = array<i64: 1, 128, 256>}, {pipeline_mode = #tpu.pipeline_mode<synchronous>, transform_indices = @transform_1, window_bounds = array<i64: 128, 1>}, {pipeline_mode = #tpu.pipeline_mode<synchronous>, transform_indices = @transform_2, window_bounds = array<i64: 128, 1>}, {transform_indices = @transform_3, window_bounds = array<i64: 1, 256, 128>}]} {
    %c0 = arith.constant 0 : index
    %c0_0 = arith.constant 0 : index
    %c0_1 = arith.constant 0 : index
    %0 = vector.load %arg2[%c0, %c0_0, %c0_1] : memref<1x128x256xf32, #tpu.memory_space<vmem>>, vector<1x128x256xf32>
    %1 = vector.shape_cast %0 : vector<1x128x256xf32> to vector<128x256xf32>
    %cst = arith.constant dense<0.000000e+00> : vector<256xf32>
    %2 = vector.multi_reduction <add>, %1, %cst [0] : vector<128x256xf32> to vector<256xf32>
    %3 = vector.shape_cast %2 : vector<256xf32> to vector<1x256xf32>
    %cst_2 = arith.constant 7.812500e-03 : f32
    %4 = vector.broadcast %cst_2 : f32 to vector<1x256xf32>
    %5 = arith.mulf %3, %4 : vector<1x256xf32>
    %6 = vector.broadcast %5 : vector<1x256xf32> to vector<128x256xf32>
    %7 = arith.subf %1, %6 : vector<128x256xf32>
    %8 = arith.mulf %7, %7 : vector<128x256xf32>
    %cst_3 = arith.constant dense<0.000000e+00> : vector<256xf32>
    %9 = vector.multi_reduction <add>, %8, %cst_3 [0] : vector<128x256xf32> to vector<256xf32>
    %10 = vector.shape_cast %9 : vector<256xf32> to vector<1x256xf32>
    %cst_4 = arith.constant 7.812500e-03 : f32
    %11 = vector.broadcast %cst_4 : f32 to vector<1x256xf32>
    %12 = arith.mulf %10, %11 : vector<1x256xf32>
    %cst_5 = arith.constant 9.99999974E-6 : f32
    %13 = vector.broadcast %cst_5 : f32 to vector<1x256xf32>
    %14 = arith.addf %12, %13 : vector<1x256xf32>
    %15 = math.rsqrt %14 : vector<1x256xf32>
    %16 = vector.broadcast %15 : vector<1x256xf32> to vector<128x256xf32>
    %17 = arith.mulf %7, %16 : vector<128x256xf32>
    %c0_6 = arith.constant 0 : index
    %c0_7 = arith.constant 0 : index
    %18 = vector.load %arg3[%c0_6, %c0_7] : memref<128x1xf32, #tpu.memory_space<vmem>>, vector<128x1xf32>
    %19 = vector.broadcast %18 : vector<128x1xf32> to vector<128x256xf32>
    %20 = arith.mulf %17, %19 : vector<128x256xf32>
    %c0_8 = arith.constant 0 : index
    %c0_9 = arith.constant 0 : index
    %21 = vector.load %arg4[%c0_8, %c0_9] : memref<128x1xf32, #tpu.memory_space<vmem>>, vector<128x1xf32>
    %22 = vector.broadcast %21 : vector<128x1xf32> to vector<128x256xf32>
    %23 = arith.addf %20, %22 : vector<128x256xf32>
    %24 = tpu.transpose %23, [1, 0] : vector<128x256xf32> -> vector<256x128xf32>
    %c0_10 = arith.constant 0 : index
    %c0_11 = arith.constant 0 : index
    %c0_12 = arith.constant 0 : index
    %25 = vector.load %arg5[%c0_10, %c0_11, %c0_12] : memref<1x256x128xf32, #tpu.memory_space<vmem>>, vector<1x256x128xf32>
    %26 = vector.shape_cast %25 : vector<1x256x128xf32> to vector<256x128xf32>
    %27 = vector.shape_cast %24 : vector<256x128xf32> to vector<1x256x128xf32>
    tpu.vector_store %arg5[%c0_10, %c0_11, %c0_12], %27 {strides = array<i32>} : memref<1x256x128xf32, #tpu.memory_space<vmem>>, vector<1x256x128xf32>,
    return
  }
  func.func @transform_0(%arg0: i32, %arg1: i32) -> (i32, i32, i32) {
    %c0_i32 = arith.constant 0 : i32
    %c0_i32_0 = arith.constant 0 : i32
    return %arg1, %c0_i32, %arg0 : i32, i32, i32
  }
  func.func @transform_1(%arg0: i32, %arg1: i32) -> (i32, i32) {
    %c0_i32 = arith.constant 0 : i32
    %c0_i32_0 = arith.constant 0 : i32
    %c0_i32_1 = arith.constant 0 : i32
    return %c0_i32, %c0_i32_0 : i32, i32
  }
  func.func @transform_2(%arg0: i32, %arg1: i32) -> (i32, i32) {
    %c0_i32 = arith.constant 0 : i32
    %c0_i32_0 = arith.constant 0 : i32
    %c0_i32_1 = arith.constant 0 : i32
    return %c0_i32, %c0_i32_0 : i32, i32
  }
  func.func @transform_3(%arg0: i32, %arg1: i32) -> (i32, i32, i32) {
    %c0_i32 = arith.constant 0 : i32
    %c0_i32_0 = arith.constant 0 : i32
    return %arg1, %arg0, %c0_i32 : i32, i32, i32
  }
}

</mosaic_0001>

<bundles_post_ra>
// kernel: tpu_custom_call.1
= control target key start
LH: loop header
LB: loop body
LE: loop exit
PB: predicated region body
PF: predicated region fallthrough
CT: control target
= control target key end

     0   :  { %8 = vsyncpa [#allocation3], 0  ;;  %s1865_s0 = inlined_call_operand.hbm [shape: f32[2,128,256], index: 0, kind: input, shape index: {}]   ;;  %s1866_s1 = inlined_call_operand.vmem [shape: f32[128,1], index: 1, kind: input, shape index: {}]   ;;  %s1867_s2 = inlined_call_operand.vmem [shape: f32[128,1], index: 2, kind: input, shape index: {}]   ;;  %s1868_s3 = inlined_call_operand.hbm [shape: f32[2,256,128], index: 3, kind: output, shape index: {}]  }
   0x1   :  { %10 = vsyncpa [#allocation3 + $0x1], 0 }
   0x2   :  { %11 = vsyncpa [#allocation4], 0 }
   0x3   :  { %13 = vsyncpa [#allocation4 + $0x1], 0  ;;  %s1136_s12 = smov 0   ;;  %s1138_s13 = smov 0  }
   0x4   :  { %s1140_s14 = smov 0   ;;  %s1142_s15 = smov 0  }
   0x5   :  { %s1144_s16 = smov 0   ;;  %s1146_s17 = smov 0  }
   0x6 LB: > { %s906_s18 = sadd.s32 4294967295, %s1109_s17   ;;  %s907_s19 = sadd.s32 4294967294, %s1109_s17   ;;  %s1109_s17 = sphi %s1146_s17, %s19_s17   ;;  %s1105_s16 = sphi %s1144_s16, %s1877_s16   ;;  %s1101_s15 = sphi %s1142_s15, %s1876_s15   ;;  %s1097_s14 = sphi %s1140_s14, %s1875_s14   ;;  %s1093_s13 = sphi %s1138_s13, %s1874_s13   ;;  %s1089_s12 = sphi %s1136_s12, %s1873_s12  }
   0x7   : > { %s28_s20 = sadd.s32 1, %s1105_s16  ;;  %s40_s21 = sadd.s32 1, %s1097_s14 }
   0x8   : > { %p29_p0 = scmp.ge.s32.totalorder %s28_s20, 2  ;;  %p47_p1 = scmp.ne.s32.totalorder %s1097_s14, %s1093_s13 }
   0x9   : > { %p48_p2 = scmp.eq.s32.totalorder %s1109_s17, 0  ;;  %p53_p3 = scmp.ne.s32.totalorder %s1093_s13, %s1089_s12 }
   0xa   : > { %s1879_s20 = smov (%p29_p0, %s28_s20), 0  ;;  %p54_p5 = scmp.eq.s32.totalorder %s906_s18, 0 }
   0xb   : > { %p1177_p4 = por %p48_p2, %p47_p1  ;;  %s35_s23 = ssub.s32 %s1105_s16, %s1879_s20 }
   0xc   : > { %p121_p6 = scmp.eq.s32.totalorder %s906_s18, 1  ;;  %p38_p7 = scmp.eq.s32.totalorder %s35_s23, 0 }
   0xd   : > { %p1183_p8 = por %p54_p5, %p53_p3  ;;  %p127_p10 = scmp.eq.s32.totalorder %s907_s19, 1 }
   0xe   : > { %p1187_p9 = por %p121_p6, %p47_p1  ;;  %p909_p12 = scmp.ge.s32.totalorder %s1109_s17, 2 }
   0xf   : > { %s1192_s26 = scalar_select %p38_p7, %s1097_s14, %s40_s21  }
  0x10   : > { %p1194_p11 = por %p127_p10, %p53_p3  ;;  %p935_p13 = scmp.lt.s32.totalorder %s1109_s17, 2 }
  0x11   : > { %s153_s28 = sand.u32 1, %s1097_s14   ;;  %s921_s30 = sshll.u32 %s1105_s16, 8 }
  0x12   : > { %s910_s29 = sshll.u32 %s153_s28, 8  ;;  %s164_s6 = scalar_lea.hbm %s1865_s0, %s921_s30 }
  0x13   : > { %s157_s7 = scalar_lea.vmem [#allocation2], %s910_s29  ;;  %s165_s9 = sshll.u32 %s164_s6, 4  ;;  %s166_s9 = int_to_ptr.hbm [resolvable:$true] %s165_s9 }
  0x14   : > { %s167_s8 = sshll.u32 %s157_s7, 4  ;;  %p928_p0 = pnand %p935_p13, %p1177_p4  ;;  %s168_s8 = int_to_ptr.vmem [resolvable:$true] %s167_s8 }
  0x15   : > { %p913_p1 = scmp.ge.s32.totalorder %s1109_s17, 1  ;;  %s154_s10 = scalar_lea.sflag [#allocation3], %s153_s28 }
  0x16   : > { %s1111_s11 = smov 256   ;;  %s1112_s18 = smov 16  }
  0x17   : > { %930 = dma.hbm_to_vmem [thread:$0]  (!%p928_p0), %s166_s9, 4096, %s168_s8, %s154_s10, %s1111_s11, %s1111_s11, %s1112_s18  }
  0x18   : > { %p175_p2 = scmp.lt.s32.totalorder %s1109_s17, 3 }
  0x1a   : > { %p176_p3 = pnand %p913_p1, %p175_p2 }
  0x1b   : > { %s1210_s19 = sand.u32 (!%p176_p3), 1, %s1093_s13  }
  0x1c   : > { %179 = sbr.rel (%p176_p3) target bundleno = 483 (0x1e3), region = 32  ;;  %s914_s21 = sshll.u32 (!%p176_p3), %s1210_s19, 8 }
  0x1d   : > { %s182_s23 = scalar_lea.sflag (!%p176_p3), [#allocation3], %s1210_s19  ;;  %s1216_s22 = scalar_lea.vmem (!%p176_p3), [#allocation2], %s914_s21 }
  0x21   : > { %1080 = dma.done.wait (%p1183_p8), %s182_s23, 4096  }
  0x22   : > { %1082 = vsyncadd (%p1183_p8), %s182_s23, 4294963200  ;;  %v1113_v0 = vmov 0   ;;  %v453_v1 = vld [vmem:[%s1866_s1 + $0x20] sm:$0xff]  ;;  %v451_v2 = vld [vmem:[%s1866_s1 + $0x10] sm:$0xff]  ;;  %s1792_s5 = scalar_lea.vmem [#allocation5], %s914_s21  ;;  %s922_s21 = sshll.u32 %s1101_s15, 8 }
  0x23   : > { %992 = vset.pattern.permute.xlu2 %v1113_v0  ;;  %991 = vset.pattern.permute.xlu1 %v1113_v0  ;;  %v449_v3 = vld [vmem:[%s1866_s1] sm:$0xff]  ;;  %v454_v4 = vld [vmem:[%s1866_s1 + $0x28] sm:$0xff]  ;;  %v452_v5 = vld [vmem:[%s1866_s1 + $0x18] sm:$0xff]  ;;  %s815_s8 = scalar_lea.hbm %s1868_s3, %s922_s21  ;;  %s816_s9 = sshll.u32 %s1792_s5, 4  ;;  %s817_s9 = int_to_ptr.vmem [resolvable:$true] %s816_s9 }
  0x24   : > { %990 = vset.pattern.permute.xlu0 %v1113_v0  ;;  %487 = vperm.xlu2 %992, %v453_v1   ;;  %v1238_v6 = vld [vmem:[%s1216_s22] sm:$0xff]  ;;  %v1241_v7 = vld [vmem:[%s1216_s22 + $0x8] sm:$0xff]  ;;  %v1244_v8 = vld [vmem:[%s1216_s22 + $0x10] sm:$0xff]  ;;  %s818_s10 = sshll.u32 %s815_s8, 4  ;;  %s802_s11 = scalar_lea.sflag [#allocation4], %s1210_s19  ;;  %s819_s10 = int_to_ptr.hbm [resolvable:$true] %s818_s10 }
  0x25   : > { %477 = vperm.xlu1 %991, %v451_v2   ;;  %467 = vperm.xlu0 %990, %v449_v3   ;;  %v1247_v9 = vld [vmem:[%s1216_s22 + $0x18] sm:$0xff]  ;;  %v1250_v10 = vld [vmem:[%s1216_s22 + $0x20] sm:$0xff]  ;;  %v450_v11 = vld [vmem:[%s1866_s1 + $0x8] sm:$0xff]  ;;  %v243_v13 = vadd.f32 %v1244_v8, %v1238_v6  ;;  %s1041_s18 = sshra.s32 %s819_s10, 4  ;;  %s1047_s29 = scalar_lea.hbm %s1868_s3, 512  ;;  %s1042_s18 = int_to_ptr.hbm [resolvable:$true] %s1041_s18 }
  0x26   : > { %v1256_v12 = vld [vmem:[%s1216_s22 + $0x28] sm:$0xff]  ;;  %v264_v14 = vadd.f32 %v1247_v9, %v1241_v7  ;;  %v1263_v15 = vld [vmem:[%s1216_s22 + $0x30] sm:$0xff]  ;;  %v1266_v16 = vld [vmem:[%s1216_s22 + $0x38] sm:$0xff]  ;;  %s1043_s23 = scalar_lea.hbm %s1042_s18, 256  ;;  %p1048_p7 = scmp.lt.s32.totalorder %s1042_s18, %s1868_s3 }
  0x27   : > { %v244_v17 = vadd.f32 %v243_v13, %v1250_v10  ;;  %v1271_v19 = vld [vmem:[%s1216_s22 + $0x40] sm:$0xff]  ;;  %v1274_v20 = vld [vmem:[%s1216_s22 + $0x48] sm:$0xff]  ;;  %v1279_v23 = vld [vmem:[%s1216_s22 + $0x50] sm:$0xff]  ;;  %p1044_p4 = scmp.ne.s32.totalorder %s1042_s18, %s1043_s23  ;;  %p1049_p8 = scmp.lt.s32.totalorder %s1047_s29, %s1043_s23 }
  0x28   : > { %v265_v18 = vadd.f32 %v264_v14, %v1256_v12  ;;  %v1282_v24 = vld [vmem:[%s1216_s22 + $0x58] sm:$0xff]  ;;  %v457_v25 = vld [vmem:[%s1866_s1 + $0x40] sm:$0xff]  ;;  %v1296_v30 = vld [vmem:[%s1216_s22 + $0x68] sm:$0xff] }
  0x29   : > { %v245_v21 = vadd.f32 %v244_v17, %v1263_v15  ;;  %v456_v28 = vld [vmem:[%s1866_s1 + $0x38] sm:$0xff]  ;;  %v1293_v29 = vld [vmem:[%s1216_s22 + $0x60] sm:$0xff]  ;;  %v455_v31 = vld [vmem:[%s1866_s1 + $0x30] sm:$0xff]  ;;  %p1045_p5 = pnand %p1044_p4, %p1187_p9  ;;  %p1050_p10 = por %p1049_p8, %p1048_p7 }
  0x2a   : > { %v266_v22 = vadd.f32 %v265_v18, %v1266_v16  ;;  %v1304_v34 = vld [vmem:[%s1216_s22 + $0x70] sm:$0xff]  ;;  %v1307_v35 = vld [vmem:[%s1216_s22 + $0x78] sm:$0xff]  ;;  %v1312_v38 = vld [vmem:[%s1216_s22 + $0x80] sm:$0xff] }
  0x2b   : > { %v246_v26 = vadd.f32 %v245_v21, %v1271_v19  ;;  %v1315_v39 = vld [vmem:[%s1216_s22 + $0x88] sm:$0xff]  ;;  %v1320_v42 = vld [vmem:[%s1216_s22 + $0x90] sm:$0xff]  ;;  %v1323_v43 = vld [vmem:[%s1216_s22 + $0x98] sm:$0xff]  ;;  %p1046_p6 = pneg %p1045_p5 }
  0x2c   : > { %492 = vperm.xlu2 %992, %v454_v4   ;;  %v267_v27 = vadd.f32 %v266_v22, %v1274_v20  ;;  %v460_v44 = vld [vmem:[%s1866_s1 + $0x58] sm:$0xff]  ;;  %v459_v47 = vld [vmem:[%s1866_s1 + $0x50] sm:$0xff]  ;;  %v1334_v48 = vld [vmem:[%s1216_s22 + $0xa0] sm:$0xff] }
  0x2d   : > { %482 = vperm.xlu1 %991, %v452_v5   ;;  %472 = vperm.xlu0 %990, %v450_v11   ;;  %v247_v32 = vadd.f32 %v246_v26, %v1279_v23  ;;  %v1337_v49 = vld [vmem:[%s1216_s22 + $0xa8] sm:$0xff]  ;;  %v1345_v53 = vld [vmem:[%s1216_s22 + $0xb0] sm:$0xff]  ;;  %v1348_v54 = vld [vmem:[%s1216_s22 + $0xb8] sm:$0xff]  ;;  %p1051_p13 = pnand %p1050_p10, %p1046_p6 }
  0x2e   : > { %v268_v33 = vadd.f32 %v267_v27, %v1282_v24  ;;  %v458_v50 = vld [vmem:[%s1866_s1 + $0x48] sm:$0xff]  ;;  %v1353_v57 = vld [vmem:[%s1216_s22 + $0xc0] sm:$0xff]  ;;  %v1361_v61 = vld [vmem:[%s1216_s22 + $0xd0] sm:$0xff] }
  0x2f   : > { %v248_v36 = vadd.f32 %v247_v32, %v1293_v29  ;;  %v1356_v58 = vld [vmem:[%s1216_s22 + $0xc8] sm:$0xff]  ;;  %v1364_v62 = vld [vmem:[%s1216_s22 + $0xd8] sm:$0xff]  ;;  %v463_v63 = vld [vmem:[%s1866_s1 + $0x70] sm:$0xff] }
  0x30   : > { %v269_v37 = vadd.f32 %v268_v33, %v1296_v30  ;;  %v462_v2 = vld [vmem:[%s1866_s1 + $0x68] sm:$0xff]  ;;  %v1375_v3 = vld [vmem:[%s1216_s22 + $0xe0] sm:$0xff]  ;;  %v1386_v14 = vld [vmem:[%s1216_s22 + $0xf0] sm:$0xff] }
  0x31   : > { %v249_v40 = vadd.f32 %v248_v36, %v1304_v34  ;;  %v1378_v4 = vld [vmem:[%s1216_s22 + $0xe8] sm:$0xff]  ;;  %v461_v5 = vld [vmem:[%s1866_s1 + $0x60] sm:$0xff]  ;;  %v1389_v17 = vld [vmem:[%s1216_s22 + $0xf8] sm:$0xff] }
  0x32   : > { %v270_v41 = vadd.f32 %v269_v37, %v1307_v35  ;;  %v464_v32 = vld [vmem:[%s1866_s1 + $0x78] sm:$0xff] }
  0x33   : > { %v250_v45 = vadd.f32 %v249_v40, %v1312_v38 }
  0x34   : > { %507 = vperm.xlu2 %992, %v457_v25   ;;  %v271_v46 = vadd.f32 %v270_v41, %v1315_v39 }
  0x35   : > { %502 = vperm.xlu1 %991, %v456_v28   ;;  %497 = vperm.xlu0 %990, %v455_v31   ;;  %v251_v51 = vadd.f32 %v250_v45, %v1320_v42  ;;  %v578_v28 = vld [vmem:[%s1867_s2 + $0x8] sm:$0xff]  ;;  %v577_v31 = vld [vmem:[%s1867_s2] sm:$0xff] }
  0x36   : > { %v272_v52 = vadd.f32 %v271_v46, %v1323_v43  ;;  %v581_v45 = vld [vmem:[%s1867_s2 + $0x20] sm:$0xff]  ;;  %v580_v46 = vld [vmem:[%s1867_s2 + $0x18] sm:$0xff] }
  0x37   : > { %v252_v55 = vadd.f32 %v251_v51, %v1334_v48 }
  0x38   : > { %v273_v56 = vadd.f32 %v272_v52, %v1337_v49 }
  0x39   : > { %v253_v59 = vadd.f32 %v252_v55, %v1345_v53 }
  0x3a   : > { %v274_v60 = vadd.f32 %v273_v56, %v1348_v54  ;;  %v584_v56 = vld [vmem:[%s1867_s2 + $0x38] sm:$0xff] }
  0x3b   : > { %v254_v0 = vadd.f32 %v253_v59, %v1353_v57  ;;  %v583_v59 = vld [vmem:[%s1867_s2 + $0x30] sm:$0xff] }
  0x3c   : > { %522 = vperm.xlu2 %992, %v460_v44   ;;  %v275_v1 = vadd.f32 %v274_v60, %v1356_v58  ;;  %v582_v60 = vld [vmem:[%s1867_s2 + $0x28] sm:$0xff] }
  0x3d   : > { %517 = vperm.xlu1 %991, %v459_v47   ;;  %512 = vperm.xlu0 %990, %v458_v50   ;;  %v255_v11 = vadd.f32 %v254_v0, %v1361_v61  ;;  %v579_v47 = vld [vmem:[%s1867_s2 + $0x10] sm:$0xff] }
  0x3e   : > { %v276_v13 = vadd.f32 %v275_v1, %v1364_v62 }
  0x3f   : > { %v256_v18 = vadd.f32 %v255_v11, %v1375_v3 }
  0x40   : > { %v277_v21 = vadd.f32 %v276_v13, %v1378_v4 }
  0x41   : > { %v257_v22 = vadd.f32 %v256_v18, %v1386_v14 }
  0x42   : > { %v278_v25 = vadd.f32 %v277_v21, %v1389_v17 }
  0x43   : > { %v258_v26 = vrot.slane %v257_v22, 4 }
  0x44   : > { %537 = vperm.xlu2 %992, %v463_v63   ;;  %v279_v27 = vrot.slane %v278_v25, 4 }
  0x45   : > { %532 = vperm.xlu1 %991, %v462_v2   ;;  %527 = vperm.xlu0 %990, %v461_v5   ;;  %v259_v33 = vadd.f32 %v258_v26, %v257_v22 }
  0x46   : > { %v280_v36 = vadd.f32 %v279_v27, %v278_v25 }
  0x47   : > { %v260_v37 = vrot.slane %v259_v33, 2 }
  0x48   : > { %v281_v40 = vrot.slane %v280_v36, 2 }
  0x49   : > { %v261_v41 = vadd.f32 %v260_v37, %v259_v33 }
  0x4a   : > { %v282_v44 = vadd.f32 %v281_v40, %v280_v36 }
  0x4b   : > { %v262_v50 = vrot.slane %v261_v41, 1 }
  0x4c   : > { %600 = vperm.xlu2 %992, %v578_v28   ;;  %v283_v51 = vrot.slane %v282_v44, 1 }
  0x4d   : > { %595 = vperm.xlu1 %991, %v577_v31   ;;  %542 = vperm.xlu0 %990, %v464_v32   ;;  %v263_v52 = vadd.f32 %v262_v50, %v261_v41 }
  0x4e   : > { %v284_v55 = vadd.f32 %v283_v51, %v282_v44  ;;  %v590_v44 = vld [vmem:[%s1867_s2 + $0x68] sm:$0xff] }
  0x4f   : > { %v1422_v63 = vmul.f32 0.0078125, %v263_v52 }
  0x50   : > { %v1424_v0 = vmul.f32 0.0078125, %v284_v55 }
  0x51   : > { %v1428_v1 = vsub.f32 %v1238_v6, %v1422_v63  ;;  %v1436_v5 = vsub.f32 %v1244_v8, %v1422_v63  ;;  %v1444_v13 = vsub.f32 %v1250_v10, %v1422_v63  ;;  %v586_v8 = vld [vmem:[%s1867_s2 + $0x48] sm:$0xff]  ;;  %v1489_v28 = vsub.f32 %v1279_v23, %v1422_v63 }
  0x52   : > { %v1432_v2 = vsub.f32 %v1241_v7, %v1424_v0  ;;  %v1440_v11 = vsub.f32 %v1247_v9, %v1424_v0  ;;  %v1448_v6 = vsub.f32 %v1256_v12, %v1424_v0  ;;  %v587_v7 = vld [vmem:[%s1867_s2 + $0x50] sm:$0xff]  ;;  %v1458_v9 = vsub.f32 %v1263_v15, %v1422_v63  ;;  %v585_v12 = vld [vmem:[%s1867_s2 + $0x40] sm:$0xff] }
  0x53   : > { %v1462_v10 = vsub.f32 %v1266_v16, %v1424_v0  ;;  %v319_v18 = vmul.f32 %v1428_v1, %v1428_v1  ;;  %v321_v22 = vmul.f32 %v1436_v5, %v1436_v5  ;;  %v1477_v16 = vsub.f32 %v1271_v19, %v1422_v63 }
  0x54   : > { %615 = vperm.xlu2 %992, %v581_v45   ;;  %v320_v21 = vmul.f32 %v1432_v2, %v1432_v2  ;;  %v322_v15 = vmul.f32 %v1440_v11, %v1440_v11  ;;  %v1481_v25 = vsub.f32 %v1274_v20, %v1424_v0  ;;  %v323_v26 = vmul.f32 %v1444_v13, %v1444_v13 }
  0x55   : > { %610 = vperm.xlu1 %991, %v580_v46   ;;  %605 = vperm.xlu0 %990, %v579_v47   ;;  %v324_v27 = vmul.f32 %v1448_v6, %v1448_v6  ;;  %v1493_v19 = vsub.f32 %v1282_v24, %v1424_v0  ;;  %v325_v31 = vmul.f32 %v1458_v9, %v1458_v9  ;;  %v588_v46 = vld [vmem:[%s1867_s2 + $0x58] sm:$0xff] }
  0x56   : > { %v326_v20 = vmul.f32 %v1462_v10, %v1462_v10  ;;  %v351_v32 = vadd.f32 %v321_v22, %v319_v18  ;;  %v372_v33 = vadd.f32 %v322_v15, %v320_v21  ;;  %v1501_v36 = vsub.f32 %v1293_v29, %v1422_v63  ;;  %v589_v29 = vld [vmem:[%s1867_s2 + $0x60] sm:$0xff] }
  0x57   : > { %v1505_v23 = vsub.f32 %v1296_v30, %v1424_v0  ;;  %v327_v24 = vmul.f32 %v1477_v16, %v1477_v16  ;;  %v328_v37 = vmul.f32 %v1481_v25, %v1481_v25  ;;  %v1519_v30 = vsub.f32 %v1304_v34, %v1422_v63 }
  0x58   : > { %v352_v40 = vadd.f32 %v351_v32, %v323_v26  ;;  %v373_v41 = vadd.f32 %v372_v33, %v324_v27  ;;  %v1523_v45 = vsub.f32 %v1307_v35, %v1424_v0  ;;  %v329_v47 = vmul.f32 %v1489_v28, %v1489_v28  ;;  %v592_v27 = vld [vmem:[%s1867_s2 + $0x78] sm:$0xff] }
  0x59   : > { %v330_v50 = vmul.f32 %v1493_v19, %v1493_v19  ;;  %v1534_v34 = vsub.f32 %v1312_v38, %v1422_v63  ;;  %v1538_v35 = vsub.f32 %v1315_v39, %v1424_v0  ;;  %v331_v55 = vmul.f32 %v1501_v36, %v1501_v36 }
  0x5a   : > { %v353_v51 = vadd.f32 %v352_v40, %v325_v31  ;;  %v374_v52 = vadd.f32 %v373_v41, %v326_v20  ;;  %v1550_v38 = vsub.f32 %v1323_v43, %v1424_v0  ;;  %v333_v39 = vmul.f32 %v1519_v30, %v1519_v30  ;;  %v591_v31 = vld [vmem:[%s1867_s2 + $0x70] sm:$0xff] }
  0x5b   : > { %v1558_v21 = vsub.f32 %v1334_v48, %v1422_v63  ;;  %v335_v43 = vmul.f32 %v1534_v34, %v1534_v34  ;;  %v336_v22 = vmul.f32 %v1538_v35, %v1538_v35  ;;  %v1573_v48 = vsub.f32 %v1345_v53, %v1422_v63 }
  0x5c   : > { %630 = vperm.xlu2 %992, %v584_v56   ;;  %v332_v56 = vmul.f32 %v1505_v23, %v1505_v23  ;;  %v338_v32 = vmul.f32 %v1550_v38, %v1550_v38  ;;  %v1588_v53 = vsub.f32 %v1353_v57, %v1422_v63  ;;  %v1604_v57 = vsub.f32 %v1364_v62, %v1424_v0 }
  0x5d   : > { %625 = vperm.xlu1 %991, %v583_v59   ;;  %620 = vperm.xlu0 %990, %v582_v60   ;;  %v354_v59 = vadd.f32 %v353_v51, %v327_v24  ;;  %v375_v60 = vadd.f32 %v374_v52, %v328_v37  ;;  %v339_v37 = vmul.f32 %v1558_v21, %v1558_v21 }
  0x5e   : > { %v1612_v51 = vsub.f32 %v1375_v3, %v1422_v63  ;;  %v343_v62 = vmul.f32 %v1588_v53, %v1588_v53  ;;  %v1628_v3 = vsub.f32 %v1389_v17, %v1424_v0 }
  0x5f   : > { %v376_v18 = vadd.f32 %v375_v60, %v330_v50  ;;  %v346_v60 = vmul.f32 %v1604_v57, %v1604_v57 }
  0x61   : > { %v377_v26 = vadd.f32 %v376_v18, %v332_v56 }
  0x64   : > { %645 = vperm.xlu2 %992, %v587_v7   ;;  %v1546_v7 = vsub.f32 %v1320_v42, %v1422_v63  ;;  %v1562_v42 = vsub.f32 %v1337_v49, %v1424_v0  ;;  %v1577_v49 = vsub.f32 %v1348_v54, %v1424_v0  ;;  %v1592_v54 = vsub.f32 %v1356_v58, %v1424_v0 }
  0x65   : > { %640 = vperm.xlu1 %991, %v586_v8   ;;  %635 = vperm.xlu0 %990, %v585_v12   ;;  %v334_v8 = vmul.f32 %v1523_v45, %v1523_v45  ;;  %v355_v12 = vadd.f32 %v354_v59, %v329_v47  ;;  %v341_v58 = vmul.f32 %v1573_v48, %v1573_v48 }
  0x66   : > { %v337_v20 = vmul.f32 %v1546_v7, %v1546_v7  ;;  %v340_v40 = vmul.f32 %v1562_v42, %v1562_v42  ;;  %v344_v52 = vmul.f32 %v1592_v54, %v1592_v54  ;;  %v1624_v59 = vsub.f32 %v1386_v14, %v1422_v63 }
  0x67   : > { %v356_v15 = vadd.f32 %v355_v12, %v331_v55  ;;  %v378_v24 = vadd.f32 %v377_v26, %v334_v8  ;;  %v347_v12 = vmul.f32 %v1612_v51, %v1612_v51 }
  0x68   : > { %v349_v17 = vmul.f32 %v1624_v59, %v1624_v59 }
  0x69   : > { %v357_v33 = vadd.f32 %v356_v15, %v333_v39 }
  0x6b   : > { %v358_v41 = vadd.f32 %v357_v33, %v335_v43 }
  0x6c   : > { %660 = vperm.xlu2 %992, %v590_v44   ;;  %v379_v44 = vadd.f32 %v378_v24, %v336_v22 }
  0x6d   : > { %655 = vperm.xlu1 %991, %v589_v29   ;;  %650 = vperm.xlu0 %990, %v588_v46   ;;  %v1600_v29 = vsub.f32 %v1361_v61, %v1422_v63  ;;  %v342_v46 = vmul.f32 %v1577_v49, %v1577_v49  ;;  %v359_v47 = vadd.f32 %v358_v41, %v337_v20 }
  0x6e   : > { %v380_v50 = vadd.f32 %v379_v44, %v338_v32  ;;  %v1616_v61 = vsub.f32 %v1378_v4, %v1424_v0  ;;  %v350_v0 = vmul.f32 %v1628_v3, %v1628_v3 }
  0x6f   : > { %v360_v55 = vadd.f32 %v359_v47, %v339_v37  ;;  %v345_v4 = vmul.f32 %v1600_v29, %v1600_v29 }
  0x70   : > { %v381_v56 = vadd.f32 %v380_v50, %v340_v40  ;;  %v348_v18 = vmul.f32 %v1616_v61, %v1616_v61 }
  0x71   : > { %v361_v39 = vadd.f32 %v360_v55, %v341_v58 }
  0x72   : > { %v382_v8 = vadd.f32 %v381_v56, %v342_v46 }
  0x73   : > { %v362_v14 = vadd.f32 %v361_v39, %v343_v62 }
  0x74   : > { %v383_v63 = vadd.f32 %v382_v8, %v344_v52 }
  0x75   : > { %670 = vperm.xlu1 %991, %v592_v27   ;;  %665 = vperm.xlu0 %990, %v591_v31   ;;  %v363_v43 = vadd.f32 %v362_v14, %v345_v4 }
  0x76   : > { %v384_v22 = vadd.f32 %v383_v63, %v346_v60 }
  0x77   : > { %v364_v15 = vadd.f32 %v363_v43, %v347_v12 }
  0x78   : > { %v385_v26 = vadd.f32 %v384_v22, %v348_v18 }
  0x79   : > { %v365_v31 = vadd.f32 %v364_v15, %v349_v17 }
  0x7a   : > { %v386_v20 = vadd.f32 %v385_v26, %v350_v0 }
  0x7b   : > { %v366_v32 = vrot.slane %v365_v31, 4 }
  0x7c   : > { %v387_v33 = vrot.slane %v386_v20, 4 }
  0x7d   : > { %v367_v24 = vadd.f32 %v366_v32, %v365_v31 }
  0x7e   : > { %v1642_v27 = vpop.permute.xlu2 %487  ;;  %v388_v37 = vadd.f32 %v387_v33, %v386_v20 }
  0x7f   : > { %v368_v40 = vrot.slane %v367_v24, 2 }
  0x80   : > { %v389_v41 = vrot.slane %v388_v37, 2 }
  0x81   : > { %v369_v44 = vadd.f32 %v368_v40, %v367_v24 }
  0x82   : > { %v390_v58 = vadd.f32 %v389_v41, %v388_v37 }
  0x83   : > { %v370_v46 = vrot.slane %v369_v44, 1 }
  0x84   : > { %v391_v47 = vrot.slane %v390_v58, 1 }
  0x85   : > { %v371_v62 = vadd.f32 %v370_v46, %v369_v44 }
  0x86   : > { %v1644_v50 = vpop.permute.xlu2 %492  ;;  %v392_v52 = vadd.f32 %v391_v47, %v390_v58 }
  0x87   : > { %v393_v55 = vmul.f32 0.0078125, %v371_v62 }
  0x88   : > { %v394_v56 = vmul.f32 0.0078125, %v392_v52 }
  0x89   : > { %v395_v4 = vadd.f32 1e-05, %v393_v55 }
  0x8a   : > { %v396_v60 = vadd.f32 1e-05, %v394_v56 }
  0x8b   : > { %993 = vrsqrt.f32 %v395_v4  ;;  %vm403_vm0 = vweird.f32 %v395_v4 }
  0x8c   : > { %995 = vrsqrt.f32 %v396_v60  ;;  %vm413_vm2 = vweird.f32 %v396_v60 }
  0x8e   : > { %v508_v39 = vpop.permute.xlu2 %507 }
  0x91   : > { %v994_v18 = vpop.eup %993 }
  0x92   : > { %v996_v14 = vpop.eup %995  ;;  %v398_v63 = vmul.f32 %v994_v18, %v395_v4  ;;  %vm404_vm1 = vweird.f32 %v994_v18 }
  0x93   : > { %v408_v17 = vmul.f32 %v996_v14, %v396_v60  ;;  %vm414_vm3 = vweird.f32 %v996_v14  ;;  %vm405_vm4 = vmor %vm403_vm0, %vm404_vm1 }
  0x94   : > { %v399_v0 = vmul.f32 %v994_v18, %v398_v63  ;;  %vm415_vm5 = vmor %vm413_vm2, %vm414_vm3 }
  0x95   : > { %v409_v43 = vmul.f32 %v996_v14, %v408_v17 }
  0x96   : > { %v400_v15 = vmul.f32 0.5, %v399_v0  ;;  %v523_v20 = vpop.permute.xlu2 %522 }
  0x97   : > { %v1646_v8 = vpop.permute.xlu1 %477  ;;  %v1648_v12 = vpop.permute.xlu0 %467  ;;  %v410_v31 = vmul.f32 0.5, %v409_v43 }
  0x98   : > { %v401_v32 = vsub.f32 1.5, %v400_v15 }
  0x99   : > { %v411_v33 = vsub.f32 1.5, %v410_v31 }
  0x9a   : > { %v402_v24 = vmul.f32 %v994_v18, %v401_v32 }
  0x9b   : > { %v412_v37 = vmul.f32 %v996_v14, %v411_v33 }
  0x9c   : > { %v1654_v40 = vsel %vm405_vm4, %v994_v18, %v402_v24 }
  0x9d   : > { %v1656_v41 = vsel %vm415_vm5, %v996_v14, %v412_v37  ;;  %v433_v44 = vmul.f32 %v1654_v40, %v1534_v34  ;;  %v439_v47 = vmul.f32 %v1654_v40, %v1573_v48  ;;  %v435_v0 = vmul.f32 %v1654_v40, %v1546_v7 }
  0x9e   : > { %v434_v46 = vmul.f32 %v1656_v41, %v1538_v35  ;;  %v440_v55 = vmul.f32 %v1656_v41, %v1577_v49  ;;  %v538_v60 = vpop.permute.xlu2 %537  ;;  %v445_v35 = vmul.f32 %v1654_v40, %v1612_v51  ;;  %v446_v48 = vmul.f32 %v1656_v41, %v1616_v61 }
  0x9f   : > { %v1650_v22 = vpop.permute.xlu1 %482  ;;  %v1652_v26 = vpop.permute.xlu0 %472  ;;  %v1668_v52 = vmul.f32 %v508_v39, %v433_v44  ;;  %v1674_v4 = vmul.f32 %v523_v20, %v439_v47  ;;  %v437_v49 = vmul.f32 %v1654_v40, %v1558_v21  ;;  %v436_v51 = vmul.f32 %v1656_v41, %v1550_v38 }
  0xa0   : > { %v1672_v56 = vmul.f32 %v508_v39, %v434_v46  ;;  %v1676_v34 = vmul.f32 %v523_v20, %v440_v55  ;;  %v1682_v18 = vmul.f32 %v538_v60, %v445_v35  ;;  %v1684_v14 = vmul.f32 %v538_v60, %v446_v48 }
  0xa1   : > { %v438_v39 = vmul.f32 %v1656_v41, %v1562_v42  ;;  %v443_v61 = vmul.f32 %v1654_v40, %v1600_v29  ;;  %v444_v15 = vmul.f32 %v1656_v41, %v1604_v57  ;;  %v441_v42 = vmul.f32 %v1654_v40, %v1588_v53 }
  0xa2   : > { %v442_v7 = vmul.f32 %v1656_v41, %v1592_v54  ;;  %v417_v37 = vmul.f32 %v1654_v40, %v1428_v1  ;;  %v418_v53 = vmul.f32 %v1656_v41, %v1432_v2  ;;  %v447_v54 = vmul.f32 %v1654_v40, %v1624_v59 }
  0xa3   : > { %v448_v44 = vmul.f32 %v1656_v41, %v1628_v3  ;;  %v419_v2 = vmul.f32 %v1654_v40, %v1436_v5  ;;  %v420_v59 = vmul.f32 %v1656_v41, %v1440_v11 }
  0xa4   : > { %v545_v46 = vmul.f32 %v1648_v12, %v417_v37  ;;  %v546_v47 = vmul.f32 %v1648_v12, %v418_v53  ;;  %v426_v53 = vmul.f32 %v1656_v41, %v1481_v25 }
  0xa5   : > { %v548_v12 = vmul.f32 %v1652_v26, %v420_v59 }
  0xa6   : > { %v601_v3 = vpop.permute.xlu2 %600 }
  0xa7   : > { %v1660_v58 = vpop.permute.xlu1 %502  ;;  %v1666_v62 = vpop.permute.xlu0 %497 }
  0xaf   : > { %v518_v63 = vpop.permute.xlu1 %517  ;;  %v513_v17 = vpop.permute.xlu0 %512 }
  0xb0   : > { %v1692_v43 = vmul.f32 %v518_v63, %v437_v49  ;;  %v1700_v31 = vmul.f32 %v518_v63, %v438_v39  ;;  %v1702_v21 = vmul.f32 %v513_v17, %v435_v0  ;;  %v1708_v20 = vmul.f32 %v513_v17, %v436_v51 }
  0xb1   : > { %v547_v17 = vmul.f32 %v1652_v26, %v419_v2  ;;  %v676_v39 = vadd.f32 %v601_v3, %v548_v12  ;;  %v421_v0 = vmul.f32 %v1654_v40, %v1444_v13  ;;  %v422_v51 = vmul.f32 %v1656_v41, %v1448_v6 }
  0xb2   : > { %v423_v26 = vmul.f32 %v1654_v40, %v1458_v9  ;;  %v616_v9 = vpop.permute.xlu2 %615 }
  0xb3   : > { %v675_v49 = vadd.f32 %v601_v3, %v547_v17  ;;  %v549_v11 = vmul.f32 %v1646_v8, %v421_v0  ;;  %v432_v17 = vmul.f32 %v1656_v41, %v1523_v45 }
  0xb4   : > { %v551_v6 = vmul.f32 %v1650_v22, %v423_v26 }
  0xb5   : > { %v560_v12 = vmul.f32 %v1660_v58, %v432_v17 }
  0xb7   : > { %v533_v32 = vpop.permute.xlu1 %532  ;;  %v528_v29 = vpop.permute.xlu0 %527 }
  0xb8   : > { %v1710_v38 = vmul.f32 %v533_v32, %v443_v61  ;;  %v1712_v33 = vmul.f32 %v533_v32, %v444_v15  ;;  %v1714_v24 = vmul.f32 %v528_v29, %v441_v42  ;;  %v1716_v57 = vmul.f32 %v528_v29, %v442_v7 }
  0xb9   : > { %v550_v61 = vmul.f32 %v1646_v8, %v422_v51  ;;  %v424_v7 = vmul.f32 %v1656_v41, %v1462_v10  ;;  %v425_v8 = vmul.f32 %v1654_v40, %v1477_v16 }
  0xbb   : > { %v552_v32 = vmul.f32 %v1650_v22, %v424_v7  ;;  %v553_v10 = vmul.f32 %v1642_v27, %v425_v8  ;;  %v427_v22 = vmul.f32 %v1654_v40, %v1489_v28 }
  0xbd   : > { %v555_v25 = vmul.f32 %v1644_v50, %v427_v22 }
  0xbf   : > { %v596_v55 = vpop.permute.xlu1 %595  ;;  %v543_v48 = vpop.permute.xlu0 %542 }
  0xc0   : > { %v673_v60 = vadd.f32 %v596_v55, %v545_v46  ;;  %v674_v35 = vadd.f32 %v596_v55, %v546_v47  ;;  %v1728_v63 = vmul.f32 %v543_v48, %v447_v54  ;;  %v1730_v1 = vmul.f32 %v543_v48, %v448_v44 }
  0xc1   : > { %v554_v54 = vmul.f32 %v1642_v27, %v426_v53  ;;  %v681_v44 = vadd.f32 %v616_v9, %v553_v10  ;;  %v428_v47 = vmul.f32 %v1656_v41, %v1493_v19  ;;  %v429_v27 = vmul.f32 %v1654_v40, %v1501_v36  ;;  %v631_v36 = vpop.permute.xlu2 %630 }
  0xc2   : > { %737 = vxpose.xlu0.b32.start [1/16] %v674_v35, 128  ;;  %705 = vxpose.xlu2.b32.start [1/16] %v673_v60, 128  ;;  %v430_v48 = vmul.f32 %v1656_v41, %v1505_v23 }
  0xc3   : > { %v682_v46 = vadd.f32 %v616_v9, %v554_v54  ;;  %v556_v55 = vmul.f32 %v1644_v50, %v428_v47  ;;  %v557_v19 = vmul.f32 %v1666_v62, %v429_v27  ;;  %v431_v50 = vmul.f32 %v1654_v40, %v1519_v30 }
  0xc4   : > { %v558_v2 = vmul.f32 %v1666_v62, %v430_v48 }
  0xc5   : > { %v559_v23 = vmul.f32 %v1660_v58, %v431_v50 }
  0xc7   : > { %v606_v5 = vpop.permute.xlu0 %605  ;;  %v611_v13 = vpop.permute.xlu1 %610 }
  0xc8   : > { %v677_v15 = vadd.f32 %v606_v5, %v549_v11  ;;  %v678_v42 = vadd.f32 %v606_v5, %v550_v61  ;;  %v679_v29 = vadd.f32 %v611_v13, %v551_v6  ;;  %v680_v37 = vadd.f32 %v611_v13, %v552_v32 }
  0xc9   : > { %v646_v41 = vpop.permute.xlu2 %645 }
  0xca   : > { %738 = vxpose.xlu0.b32.cont [2/16] %v676_v39, 128  ;;  %706 = vxpose.xlu2.b32.cont [2/16] %v675_v49, 128  ;;  %v687_v49 = vadd.f32 %v631_v36, %v559_v23  ;;  %v688_v39 = vadd.f32 %v631_v36, %v560_v12  ;;  %v693_v58 = vadd.f32 %v646_v41, %v1692_v43 }
  0xcb   : > { %v694_v5 = vadd.f32 %v646_v41, %v1700_v31 }
  0xcf   : > { %v621_v16 = vpop.permute.xlu0 %620  ;;  %v626_v28 = vpop.permute.xlu1 %625 }
  0xd0   : > { %v683_v60 = vadd.f32 %v621_v16, %v555_v25  ;;  %v684_v35 = vadd.f32 %v621_v16, %v556_v55  ;;  %v685_v59 = vadd.f32 %v626_v28, %v557_v19  ;;  %v686_v3 = vadd.f32 %v626_v28, %v558_v2 }
  0xd2   : > { %739 = vxpose.xlu0.b32.cont [3/16] %v678_v42, 128  ;;  %707 = vxpose.xlu2.b32.cont [3/16] %v677_v15, 128  ;;  %v661_v15 = vpop.permute.xlu2 %660 }
  0xd3   : > { %v699_v43 = vadd.f32 %v661_v15, %v1710_v38  ;;  %v700_v31 = vadd.f32 %v661_v15, %v1712_v33 }
  0xd7   : > { %v636_v62 = vpop.permute.xlu0 %635  ;;  %v641_v30 = vpop.permute.xlu1 %640 }
  0xd8   : > { %v689_v0 = vadd.f32 %v636_v62, %v1668_v52  ;;  %v690_v51 = vadd.f32 %v636_v62, %v1672_v56  ;;  %v691_v45 = vadd.f32 %v641_v30, %v1702_v21  ;;  %v692_v40 = vadd.f32 %v641_v30, %v1708_v20 }
  0xda   : > { %740 = vxpose.xlu0.b32.cont [4/16] %v680_v37, 128  ;;  %708 = vxpose.xlu2.b32.cont [4/16] %v679_v29, 128 }
  0xdf   : > { %v651_v11 = vpop.permute.xlu0 %650  ;;  %v656_v61 = vpop.permute.xlu1 %655 }
  0xe0   : > { %v695_v52 = vadd.f32 %v651_v11, %v1674_v4  ;;  %v696_v56 = vadd.f32 %v651_v11, %v1676_v34  ;;  %v697_v21 = vadd.f32 %v656_v61, %v1714_v24  ;;  %v698_v20 = vadd.f32 %v656_v61, %v1716_v57 }
  0xe2   : > { %741 = vxpose.xlu0.b32.cont [5/16] %v682_v46, 128  ;;  %709 = vxpose.xlu2.b32.cont [5/16] %v681_v44, 128 }
  0xe7   : > { %v666_v4 = vpop.permute.xlu0 %665  ;;  %v671_v24 = vpop.permute.xlu1 %670 }
  0xe8   : > { %v701_v34 = vadd.f32 %v666_v4, %v1682_v18  ;;  %v702_v42 = vadd.f32 %v666_v4, %v1684_v14  ;;  %v703_v57 = vadd.f32 %v671_v24, %v1728_v63  ;;  %v704_v26 = vadd.f32 %v671_v24, %v1730_v1 }
  0xea   : > { %742 = vxpose.xlu0.b32.cont [6/16] %v684_v35, 128  ;;  %710 = vxpose.xlu2.b32.cont [6/16] %v683_v60, 128 }
  0xf2   : > { %743 = vxpose.xlu0.b32.cont [7/16] %v686_v3, 128  ;;  %711 = vxpose.xlu2.b32.cont [7/16] %v685_v59, 128 }
  0xfa   : > { %744 = vxpose.xlu0.b32.cont [8/16] %v688_v39, 128  ;;  %712 = vxpose.xlu2.b32.cont [8/16] %v687_v49, 128 }
 0x102   : > { %745 = vxpose.xlu0.b32.cont [9/16] %v690_v51, 128  ;;  %713 = vxpose.xlu2.b32.cont [9/16] %v689_v0, 128 }
 0x10a   : > { %746 = vxpose.xlu0.b32.cont [10/16] %v692_v40, 128  ;;  %714 = vxpose.xlu2.b32.cont [10/16] %v691_v45, 128 }
 0x112   : > { %747 = vxpose.xlu0.b32.cont [11/16] %v694_v5, 128  ;;  %715 = vxpose.xlu2.b32.cont [11/16] %v693_v58, 128 }
 0x11a   : > { %748 = vxpose.xlu0.b32.cont [12/16] %v696_v56, 128  ;;  %716 = vxpose.xlu2.b32.cont [12/16] %v695_v52, 128 }
 0x122   : > { %749 = vxpose.xlu0.b32.cont [13/16] %v698_v20, 128  ;;  %717 = vxpose.xlu2.b32.cont [13/16] %v697_v21, 128 }
 0x12a   : > { %750 = vxpose.xlu0.b32.cont [14/16] %v700_v31, 128  ;;  %718 = vxpose.xlu2.b32.cont [14/16] %v699_v43, 128 }
 0x132   : > { %751 = vxpose.xlu0.b32.cont [15/16] %v702_v42, 128  ;;  %719 = vxpose.xlu2.b32.cont [15/16] %v701_v34, 128 }
 0x13a   : > { %752 = vxpose.xlu0.b32.end [16/16] %v704_v26, 128  ;;  %720 = vxpose.xlu2.b32.end [16/16] %v703_v57, 128 }
 0x15b   : > { %v721_v7 = vpop.trf.xlu2 }
 0x15c   : > { %769 = vst [vmem:[%s1792_s5] sm:$0xff] %v721_v7 }
 0x163   : > { %v722_v18 = vpop.trf.xlu2 }
 0x164   : > { %770 = vst [vmem:[%s1792_s5 + $0x8] sm:$0xff] %v722_v18 }
 0x166   : > { %v753_v14 = vpop.trf.xlu0 }
 0x167   : > { %785 = vst [vmem:[%s1792_s5 + $0x80] sm:$0xff] %v753_v14 }
 0x16b   : > { %v723_v38 = vpop.trf.xlu2 }
 0x16c   : > { %771 = vst [vmem:[%s1792_s5 + $0x10] sm:$0xff] %v723_v38 }
 0x16e   : > { %v754_v33 = vpop.trf.xlu0 }
 0x16f   : > { %786 = vst [vmem:[%s1792_s5 + $0x88] sm:$0xff] %v754_v33 }
 0x173   : > { %v724_v63 = vpop.trf.xlu2 }
 0x174   : > { %772 = vst [vmem:[%s1792_s5 + $0x18] sm:$0xff] %v724_v63 }
 0x176   : > { %v755_v1 = vpop.trf.xlu0 }
 0x177   : > { %787 = vst [vmem:[%s1792_s5 + $0x90] sm:$0xff] %v755_v1 }
 0x17b   : > { %v725_v13 = vpop.trf.xlu2 }
 0x17c   : > { %773 = vst [vmem:[%s1792_s5 + $0x20] sm:$0xff] %v725_v13 }
 0x17e   : > { %v756_v6 = vpop.trf.xlu0 }
 0x17f   : > { %788 = vst [vmem:[%s1792_s5 + $0x98] sm:$0xff] %v756_v6 }
 0x183   : > { %v726_v32 = vpop.trf.xlu2 }
 0x184   : > { %774 = vst [vmem:[%s1792_s5 + $0x28] sm:$0xff] %v726_v32 }
 0x186   : > { %v757_v29 = vpop.trf.xlu0 }
 0x187   : > { %789 = vst [vmem:[%s1792_s5 + $0xa0] sm:$0xff] %v757_v29 }
 0x18b   : > { %v727_v37 = vpop.trf.xlu2 }
 0x18c   : > { %775 = vst [vmem:[%s1792_s5 + $0x30] sm:$0xff] %v727_v37 }
 0x18e   : > { %v758_v8 = vpop.trf.xlu0 }
 0x18f   : > { %790 = vst [vmem:[%s1792_s5 + $0xa8] sm:$0xff] %v758_v8 }
 0x193   : > { %v728_v53 = vpop.trf.xlu2 }
 0x194   : > { %776 = vst [vmem:[%s1792_s5 + $0x38] sm:$0xff] %v728_v53 }
 0x196   : > { %v759_v9 = vpop.trf.xlu0 }
 0x197   : > { %791 = vst [vmem:[%s1792_s5 + $0xb0] sm:$0xff] %v759_v9 }
 0x19b   : > { %v729_v10 = vpop.trf.xlu2 }
 0x19c   : > { %777 = vst [vmem:[%s1792_s5 + $0x40] sm:$0xff] %v729_v10 }
 0x19e   : > { %v760_v54 = vpop.trf.xlu0 }
 0x19f   : > { %792 = vst [vmem:[%s1792_s5 + $0xb8] sm:$0xff] %v760_v54 }
 0x1a3   : > { %v730_v44 = vpop.trf.xlu2 }
 0x1a4   : > { %778 = vst [vmem:[%s1792_s5 + $0x48] sm:$0xff] %v730_v44 }
 0x1a6   : > { %v761_v46 = vpop.trf.xlu0 }
 0x1a7   : > { %793 = vst [vmem:[%s1792_s5 + $0xc0] sm:$0xff] %v761_v46 }
 0x1ab   : > { %v731_v22 = vpop.trf.xlu2 }
 0x1ac   : > { %779 = vst [vmem:[%s1792_s5 + $0x50] sm:$0xff] %v731_v22 }
 0x1ae   : > { %v762_v47 = vpop.trf.xlu0 }
 0x1af   : > { %794 = vst [vmem:[%s1792_s5 + $0xc8] sm:$0xff] %v762_v47 }
 0x1b3   : > { %v732_v16 = vpop.trf.xlu2 }
 0x1b4   : > { %780 = vst [vmem:[%s1792_s5 + $0x58] sm:$0xff] %v732_v16 }
 0x1b6   : > { %v763_v25 = vpop.trf.xlu0 }
 0x1b7   : > { %795 = vst [vmem:[%s1792_s5 + $0xd0] sm:$0xff] %v763_v25 }
 0x1bb   : > { %v733_v55 = vpop.trf.xlu2 }
 0x1bc   : > { %781 = vst [vmem:[%s1792_s5 + $0x60] sm:$0xff] %v733_v55 }
 0x1be   : > { %v764_v60 = vpop.trf.xlu0 }
 0x1bf   : > { %796 = vst [vmem:[%s1792_s5 + $0xd8] sm:$0xff] %v764_v60 }
 0x1c3   : > { %v734_v35 = vpop.trf.xlu2 }
 0x1c4   : > { %782 = vst [vmem:[%s1792_s5 + $0x68] sm:$0xff] %v734_v35 }
 0x1c6   : > { %v765_v27 = vpop.trf.xlu0 }
 0x1c7   : > { %797 = vst [vmem:[%s1792_s5 + $0xe0] sm:$0xff] %v765_v27 }
 0x1cb   : > { %v735_v48 = vpop.trf.xlu2 }
 0x1cc   : > { %783 = vst [vmem:[%s1792_s5 + $0x70] sm:$0xff] %v735_v48 }
 0x1ce   : > { %v766_v28 = vpop.trf.xlu0 }
 0x1cf   : > { %798 = vst [vmem:[%s1792_s5 + $0xe8] sm:$0xff] %v766_v28 }
 0x1d3   : > { %v736_v19 = vpop.trf.xlu2 }
 0x1d4   : > { %784 = vst [vmem:[%s1792_s5 + $0x78] sm:$0xff] %v736_v19 }
 0x1d6   : > { %v767_v2 = vpop.trf.xlu0 }
 0x1d7   : > { %799 = vst [vmem:[%s1792_s5 + $0xf0] sm:$0xff] %v767_v2 }
 0x1de   : > { %v768_v59 = vpop.trf.xlu0 }
 0x1df   : > { %800 = vst [vmem:[%s1792_s5 + $0xf8] sm:$0xff] %v768_v59 }
 0x1e0   : > { %1054 = shalt.err (!%p1051_p13)
}
 0x1e1   : > { %s1114_s19 = smov 128   ;;  %s1115_s24 = smov 8  }
 0x1e2   : > { %925 = dma.vmem_to_hbm [thread:$0]  (%p1187_p9), %s817_s9, 4096, %s819_s10, %s802_s11, %s1114_s19, %s1114_s19, %s1115_s24  }
 0x1e3 PF: > { %s833_s22 = sand.u32 1, %s1089_s12   ;;  %p932_p0 = pnand %p909_p12, %p1194_p11 }
 0x1e4   : > { %s834_s5 = scalar_lea.sflag [#allocation4], %s833_s22 }
 0x1e5   : > { %p933_p1 = pneg %p932_p0 }
 0x1e7   : > { %1084 = dma.done.wait (%p933_p1), %s834_s5, 4096  }
 0x1e8   : > { %1086 = vsyncadd (%p933_p1), %s834_s5, 4294963200  ;;  %s19_s17 = sadd.s32 1, %s1109_s17   ;;  %s1873_s12 = smov %s1093_s13 }
 0x1e9   : > { %p16_p2 = scmp.ge.s32.totalorder %s19_s17, 4   ;;  %s1874_s13 = smov %s1097_s14 }
 0x1ea   : > { %s1875_s14 = smov %s1192_s26  ;;  %s1876_s15 = smov %s1105_s16 }
 0x1eb   : > { %s1877_s16 = smov %s1879_s20  ;;  %18 = sbr.rel (!%p16_p2) target bundleno = 6 (0x6), region = 77 }
 0x1f0   :  { %840 = vsyncpa [#allocation3], 1 }
 0x1f1   :  { %842 = vsyncpa [#allocation3 + $0x1], 1 }
 0x1f2   :  { %843 = vsyncpa [#allocation4], 1 }
 0x1f3   :  { %845 = vsyncpa [#allocation4 + $0x1], 1 }

</bundles_post_ra>
